<compile_context>
chip_gen: v7x
topology: tpu7x:2x2x1
jax: 0.10.0
libtpu: 0.0.40
codegen_flags: <defaults>
</compile_context>

<pallas_src>
import math
from functools import partial

import jax
import jax.numpy as jnp
from jax.experimental import pallas as pl
from jax.experimental.pallas import tpu as pltpu


# ----------------------------------------------------------------------------
# Fused FFN kernel: one TM-row tile of  y = relu(x @ W1^T + b1) @ W2^T + b2
# ----------------------------------------------------------------------------
def _ffn_kernel(x_ref, w1t_ref, b1_ref, w2t_ref, b2_ref, o_ref, *, use_bf16):
    x = x_ref[...]                                   # (TM, E) f32
    w1t = w1t_ref[...]                               # (E, E)  f32 or bf16
    w2t = w2t_ref[...]                               # (E, E)  f32 or bf16

    if use_bf16:
        x_mm = x.astype(jnp.bfloat16)
    else:
        x_mm = x

    # layer 1: x @ W1^T + b1, ReLU  (MXU matmul, f32 accumulate, f32 epilogue)
    h = jnp.dot(x_mm, w1t, preferred_element_type=jnp.float32) + b1_ref[...]
    h = jnp.maximum(h, jnp.float32(0.0))             # ReLU in f32 (VPU)

    if use_bf16:
        h_mm = h.astype(jnp.bfloat16)
    else:
        h_mm = h

    # layer 2: h @ W2^T + b2
    y = jnp.dot(h_mm, w2t, preferred_element_type=jnp.float32) + b2_ref[...]
    o_ref[...] = y.astype(o_ref.dtype)


def transformer_ffn_forward(params, in_fea, *, tm=256, use_bf16=False):
    """in_fea: (..., E).  params: torch-style w1/w2 of shape (E, E), b1/b2 (E,)."""
    orig_shape = in_fea.shape
    E = orig_shape[-1]
    x2d = in_fea.reshape(-1, E).astype(jnp.float32)
    n = x2d.shape[0]

    # Row-tile size: multiple of 8 (sublane) when tiling; single full tile if small.
    tm = min(tm, n)
    if tm < n and tm % 8 != 0:
        tm = max(8, (tm // 8) * 8)
    n_pad = pl.cdiv(n, tm) * tm
    if n_pad != n:
        x2d = jnp.pad(x2d, ((0, n_pad - n), (0, 0)))

    mm_dtype = jnp.bfloat16 if use_bf16 else jnp.float32
    w1t = params["w1"].T.astype(mm_dtype)            # (E_in, E_out)
    w2t = params["w2"].T.astype(mm_dtype)
    b1 = params["b1"].reshape(1, E).astype(jnp.float32)
    b2 = params["b2"].reshape(1, E).astype(jnp.float32)

    grid = (n_pad // tm,)

    # Explicit VMEM budget: double-buffered x/y tiles + resident weights + slack.
    w_bytes = 2 if use_bf16 else 4
    vmem_bytes = (
        2 * tm * E * 4            # x tile (double-buffered)
        + 2 * tm * E * 4          # y tile (double-buffered)
        + 2 * 2 * E * E * w_bytes # two weight slabs (budget 2 bufs each)
        + 4 * E * 4               # biases
        + 4 * tm * E * 4          # hidden / temporaries headroom
    )
    vmem_limit = int(min(max(vmem_bytes, 8 * 2**20), 48 * 2**20))

    kernel = partial(_ffn_kernel, use_bf16=use_bf16)
    out = pl.pallas_call(
        kernel,
        out_shape=jax.ShapeDtypeStruct((n_pad, E), jnp.float32),
        grid=grid,
        in_specs=[
            pl.BlockSpec((tm, E), lambda i: (i, 0)),   # x row tile
            pl.BlockSpec((E, E), lambda i: (0, 0)),    # W1^T (resident)
            pl.BlockSpec((1, E), lambda i: (0, 0)),    # b1
            pl.BlockSpec((E, E), lambda i: (0, 0)),    # W2^T (resident)
            pl.BlockSpec((1, E), lambda i: (0, 0)),    # b2
        ],
        out_specs=pl.BlockSpec((tm, E), lambda i: (i, 0)),  # lane-dense (E) store
        compiler_params=pltpu.CompilerParams(
            dimension_semantics=("parallel",),
            vmem_limit_bytes=vmem_limit,
        ),
    )(x2d, w1t, b1, w2t, b2)

    if n_pad != n:
        out = out[:n]
    return out.reshape(orig_shape)


# ----------------------------------------------------------------------------
# Parameter init (deterministic; mirrors torch.nn.Linear default uniform init)
# ----------------------------------------------------------------------------
def init_params(key, emb_size):
    ks = jax.random.split(key, 4)
    bound = 1.0 / math.sqrt(emb_size)

    def u(k, shape):
        return jax.random.uniform(k, shape, jnp.float32, -bound, bound)

    return {
        "w1": u(ks[0], (emb_size, emb_size)),   # torch-style (out, in)
        "b1": u(ks[1], (emb_size,)),
        "w2": u(ks[2], (emb_size, emb_size)),
        "b2": u(ks[3], (emb_size,)),
    }


def _reference_ffn(params, x):
    h = jnp.maximum(x @ params["w1"].T + params["b1"], 0.0)
    return h @ params["w2"].T + params["b2"]


if __name__ == "__main__":
    bs, seq, emb_size = 2, 8, 32
    key = jax.random.PRNGKey(0)
    kx, kp = jax.random.split(key, 2)

    in_fea = jax.random.normal(kx, (bs, seq, emb_size), jnp.float32)
    params = init_params(kp, emb_size)

    # f32 path (exact semantics) — check against a pure-JAX reference.
    out = transformer_ffn_forward(params, in_fea, use_bf16=False)
    out = jax.block_until_ready(out)
    assert out.shape == (bs, seq, emb_size)
    assert bool(jnp.all(jnp.isfinite(out)))
    ref = _reference_ffn(params, in_fea)
    assert bool(jnp.allclose(out, ref, rtol=1e-4, atol=1e-4))

    # bf16-MXU path (v6e/v7x throughput option) — just verify it runs clean.
    out_bf16 = transformer_ffn_forward(params, in_fea, use_bf16=True)
    out_bf16 = jax.block_until_ready(out_bf16)
    assert out_bf16.shape == (bs, seq, emb_size)
    assert bool(jnp.all(jnp.isfinite(out_bf16)))

    print("KERNEL_OK")
</pallas_src>

<mosaic_0001>
module attributes {stable_mosaic.version = 11 : i64} {
  func.func @_ffn_kernel(%arg0: i32, %arg1: memref<16x32xf32, #tpu.memory_space<vmem>>, %arg2: memref<32x32xf32, #tpu.memory_space<vmem>>, %arg3: memref<1x32xf32, #tpu.memory_space<vmem>>, %arg4: memref<32x32xf32, #tpu.memory_space<vmem>>, %arg5: memref<1x32xf32, #tpu.memory_space<vmem>>, %arg6: memref<16x32xf32, #tpu.memory_space<vmem>>) attributes {dimension_semantics = [#tpu.dimension_semantics<parallel>], iteration_bounds = array<i64: 1>, scalar_prefetch = 0 : i64, scratch_operands = 0 : i64, tpu.core_type = #tpu.core_type<tc>, window_params = [{transform_indices = @transform_0, window_bounds = array<i64: 16, 32>}, {pipeline_mode = #tpu.pipeline_mode<synchronous>, transform_indices = @transform_1, window_bounds = array<i64: 32, 32>}, {pipeline_mode = #tpu.pipeline_mode<synchronous>, transform_indices = @transform_2, window_bounds = array<i64: 1, 32>}, {pipeline_mode = #tpu.pipeline_mode<synchronous>, transform_indices = @transform_3, window_bounds = array<i64: 32, 32>}, {pipeline_mode = #tpu.pipeline_mode<synchronous>, transform_indices = @transform_4, window_bounds = array<i64: 1, 32>}, {transform_indices = @transform_5, window_bounds = array<i64: 16, 32>}]} {
    %c0 = arith.constant 0 : index
    %c0_0 = arith.constant 0 : index
    %0 = vector.load %arg1[%c0, %c0_0] : memref<16x32xf32, #tpu.memory_space<vmem>>, vector<16x32xf32>
    %c0_1 = arith.constant 0 : index
    %c0_2 = arith.constant 0 : index
    %1 = vector.load %arg2[%c0_1, %c0_2] : memref<32x32xf32, #tpu.memory_space<vmem>>, vector<32x32xf32>
    %c0_3 = arith.constant 0 : index
    %c0_4 = arith.constant 0 : index
    %2 = vector.load %arg4[%c0_3, %c0_4] : memref<32x32xf32, #tpu.memory_space<vmem>>, vector<32x32xf32>
    %cst = arith.constant dense<0.000000e+00> : vector<16x32xf32>
    %3 = tpu.matmul %0, %1, %cst {dimension_numbers = #tpu.dot_dimension_numbers<[1], [0], [0], [1], [0, 0, 1, 1], [], []>} : vector<16x32xf32>, vector<32x32xf32>, vector<16x32xf32> -> vector<16x32xf32>
    %c0_5 = arith.constant 0 : index
    %c0_6 = arith.constant 0 : index
    %4 = vector.load %arg3[%c0_5, %c0_6] : memref<1x32xf32, #tpu.memory_space<vmem>>, vector<1x32xf32>
    %5 = vector.broadcast %4 : vector<1x32xf32> to vector<16x32xf32>
    %6 = arith.addf %3, %5 : vector<16x32xf32>
    %cst_7 = arith.constant 0.000000e+00 : f32
    %7 = vector.broadcast %cst_7 : f32 to vector<16x32xf32>
    %8 = arith.maximumf %6, %7 : vector<16x32xf32>
    %cst_8 = arith.constant dense<0.000000e+00> : vector<16x32xf32>
    %9 = tpu.matmul %8, %2, %cst_8 {dimension_numbers = #tpu.dot_dimension_numbers<[1], [0], [0], [1], [0, 0, 1, 1], [], []>} : vector<16x32xf32>, vector<32x32xf32>, vector<16x32xf32> -> vector<16x32xf32>
    %c0_9 = arith.constant 0 : index
    %c0_10 = arith.constant 0 : index
    %10 = vector.load %arg5[%c0_9, %c0_10] : memref<1x32xf32, #tpu.memory_space<vmem>>, vector<1x32xf32>
    %11 = vector.broadcast %10 : vector<1x32xf32> to vector<16x32xf32>
    %12 = arith.addf %9, %11 : vector<16x32xf32>
    %c0_11 = arith.constant 0 : index
    %c0_12 = arith.constant 0 : index
    %13 = vector.load %arg6[%c0_11, %c0_12] : memref<16x32xf32, #tpu.memory_space<vmem>>, vector<16x32xf32>
    tpu.vector_store %arg6[%c0_11, %c0_12], %12 {strides = array<i32>} : memref<16x32xf32, #tpu.memory_space<vmem>>, vector<16x32xf32>,
    return
  }
  func.func @transform_0(%arg0: i32) -> (i32, i32) {
    %c0_i32 = arith.constant 0 : i32
    %c0_i32_0 = arith.constant 0 : i32
    return %arg0, %c0_i32 : i32, i32
  }
  func.func @transform_1(%arg0: i32) -> (i32, i32) {
    %c0_i32 = arith.constant 0 : i32
    %c0_i32_0 = arith.constant 0 : i32
    %c0_i32_1 = arith.constant 0 : i32
    return %c0_i32, %c0_i32_0 : i32, i32
  }
  func.func @transform_2(%arg0: i32) -> (i32, i32) {
    %c0_i32 = arith.constant 0 : i32
    %c0_i32_0 = arith.constant 0 : i32
    %c0_i32_1 = arith.constant 0 : i32
    return %c0_i32, %c0_i32_0 : i32, i32
  }
  func.func @transform_3(%arg0: i32) -> (i32, i32) {
    %c0_i32 = arith.constant 0 : i32
    %c0_i32_0 = arith.constant 0 : i32
    %c0_i32_1 = arith.constant 0 : i32
    return %c0_i32, %c0_i32_0 : i32, i32
  }
  func.func @transform_4(%arg0: i32) -> (i32, i32) {
    %c0_i32 = arith.constant 0 : i32
    %c0_i32_0 = arith.constant 0 : i32
    %c0_i32_1 = arith.constant 0 : i32
    return %c0_i32, %c0_i32_0 : i32, i32
  }
  func.func @transform_5(%arg0: i32) -> (i32, i32) {
    %c0_i32 = arith.constant 0 : i32
    %c0_i32_0 = arith.constant 0 : i32
    return %arg0, %c0_i32 : i32, i32
  }
}

</mosaic_0001>

<bundles_post_ra>
// kernel: tpu_custom_call.1
= control target key start
LH: loop header
LB: loop body
LE: loop exit
PB: predicated region body
PF: predicated region fallthrough
CT: control target
= control target key end

     0   :  { %10 = vsyncpa [#allocation3], 0  ;;  %s542_s0 = inlined_call_operand.hbm [shape: f32[16,32], index: 0, kind: input, shape index: {}]   ;;  %s543_s1 = inlined_call_operand.hbm [shape: f32[32,32], index: 1, kind: input, shape index: {}]   ;;  %s544_s2 = inlined_call_operand.vmem [shape: f32[1,32], index: 2, kind: input, shape index: {}]   ;;  %s545_s3 = inlined_call_operand.hbm [shape: f32[32,32], index: 3, kind: input, shape index: {}]   ;;  %s546_s4 = inlined_call_operand.vmem [shape: f32[1,32], index: 4, kind: input, shape index: {}]   ;;  %s547_s5 = inlined_call_operand.hbm [shape: f32[16,32], index: 5, kind: output, shape index: {}]  }
   0x1   :  { %11 = vsyncpa [#allocation6], 0 }
   0x2   :  { %12 = vsyncpa [#allocation4], 0  ;;  %s427_s18 = smov [#allocation5]   ;;  %s428_s20 = smov [#allocation2]  }
   0x3   :  { %s30_s19 = sshll.u32 %s427_s18, 4  ;;  %s18_s21 = sshll.u32 %s428_s20, 4  ;;  %s31_s19 = int_to_ptr.vmem [resolvable:$true] %s30_s19  ;;  %s463_s21 = int_to_ptr.vmem [resolvable:$true] %s18_s21 }
   0x4   :  { %s333_s24 = scalar_lea.hbm %s543_s1, 512 }
   0x5   :  { %p334_p0 = scmp.ne.s32.totalorder %s543_s1, %s333_s24  ;;  %p337_p1 = scmp.lt.u32.totalorder %s333_s24, %s543_s1 }
   0x7   :  { %p339_p2 = pnand %p337_p1, %p334_p0 }
   0x9   :  { %342 = shalt.err (!%p339_p2)
}
   0xa   :  { %s343_s29 = scalar_lea.vmem %s31_s19, 512  ;;  %p348_p4 = scmp.lt.s32.totalorder %s31_s19, %s31_s19 }
   0xb   :  { %p344_p3 = scmp.ne.s32.totalorder %s31_s19, %s343_s29  ;;  %p349_p5 = scmp.lt.s32.totalorder %s343_s29, %s343_s29 }
   0xd   :  { %p350_p6 = por %p349_p5, %p348_p4 }
   0xf   :  { %p351_p7 = pnand %p350_p6, %p344_p3 }
  0x11   :  { %354 = shalt.err (!%p351_p7)
}
  0x12   :  { %s429_s30 = smov 128   ;;  %s430_s6 = smov 8  }
  0x13   :  { %36 = dma.hbm_to_vmem [thread:$0]  %s543_s1, 512, %s31_s19, [#allocation6], %s429_s30, %s429_s30, %s430_s6  }
  0x14   :  { %s355_s11 = scalar_lea.hbm %s542_s0, 256 }
  0x15   :  { %p356_p8 = scmp.ne.s32.totalorder %s542_s0, %s355_s11  ;;  %p359_p9 = scmp.lt.u32.totalorder %s355_s11, %s542_s0 }
  0x17   :  { %p361_p10 = pnand %p359_p9, %p356_p8 }
  0x19   :  { %364 = shalt.err (!%p361_p10)
}
  0x1a   :  { %s365_s16 = scalar_lea.vmem %s463_s21, 256  ;;  %p370_p12 = scmp.lt.s32.totalorder %s463_s21, %s463_s21 }
  0x1b   :  { %p366_p11 = scmp.ne.s32.totalorder %s463_s21, %s365_s16  ;;  %p371_p13 = scmp.lt.s32.totalorder %s365_s16, %s365_s16 }
  0x1d   :  { %p372_p0 = por %p371_p13, %p370_p12 }
  0x1f   :  { %p373_p1 = pnand %p372_p0, %p366_p11 }
  0x21   :  { %376 = shalt.err (!%p373_p1)
}
  0x22   :  { %24 = dma.hbm_to_vmem [thread:$0]  %s542_s0, 256, %s463_s21, [#allocation3], %s429_s30, %s429_s30, %s430_s6  }
  0x23   :  { %s431_s18 = smov [#allocation7]   ;;  %s377_s23 = scalar_lea.hbm %s545_s3, 512 }
  0x24   :  { %s44_s19 = sshll.u32 %s431_s18, 4  ;;  %p378_p2 = scmp.ne.s32.totalorder %s545_s3, %s377_s23  ;;  %s45_s19 = int_to_ptr.vmem [resolvable:$true] %s44_s19 }
  0x25   :  { %p381_p3 = scmp.lt.u32.totalorder %s377_s23, %s545_s3 }
  0x27   :  { %p383_p4 = pnand %p381_p3, %p378_p2 }
  0x29   :  { %386 = shalt.err (!%p383_p4)
}
  0x2a   :  { %s387_s28 = scalar_lea.vmem %s45_s19, 512  ;;  %p392_p6 = scmp.lt.s32.totalorder %s45_s19, %s45_s19 }
  0x2b   :  { %p388_p5 = scmp.ne.s32.totalorder %s45_s19, %s387_s28  ;;  %p393_p7 = scmp.lt.s32.totalorder %s387_s28, %s387_s28 }
  0x2d   :  { %p394_p8 = por %p393_p7, %p392_p6 }
  0x2f   :  { %p395_p9 = pnand %p394_p8, %p388_p5 }
  0x31   :  { %398 = shalt.err (!%p395_p9)
}
  0x32   :  { %50 = dma.hbm_to_vmem [thread:$0]  %s545_s3, 512, %s45_s19, [#allocation6], %s429_s30, %s429_s30, %s430_s6  }
  0x33   :  { %421 = dma.done.wait [#allocation3], 256  }
  0x34   :  { %422 = vsyncadd [#allocation3], 4294967040 }
  0x35   :  { %423 = dma.done.wait [#allocation6], 1024  }
  0x36   :  { %424 = vsyncadd [#allocation6], 4294966272  ;;  %vm79_vm0 = vcmask 261120   ;;  %v64_v0 = vld [vmem:[#allocation5] sm:$0xff]  ;;  %v65_v1 = vld [vmem:[#allocation5 + $0x8] sm:$0xff]  ;;  %s432_s9 = smov [#allocation8]  }
  0x37   :  { %v66_v2 = vld [vmem:[#allocation5 + $0x10] sm:$0xff]  ;;  %v311_v3 = vpack.c.bf16 %v65_v1, %v64_v0  ;;  %v67_v4 = vld [vmem:[#allocation5 + $0x18] sm:$0xff]  ;;  %v68_v7 = vld [vmem:[#allocation7] sm:$0xff]  ;;  %s258_s10 = sshll.u32 %s432_s9, 4  ;;  %s259_s10 = int_to_ptr.vmem [resolvable:$true] %s258_s10 }
  0x38   :  { %v62_v5 = vld [vmem:[#allocation2] sm:$0xff]  ;;  %v315_v6 = vpack.c.bf16 %v67_v4, %v66_v2  ;;  %v69_v8 = vld [vmem:[#allocation7 + $0x8] sm:$0xff]  ;;  %v63_v10 = vld [vmem:[#allocation2 + $0x8] sm:$0xff]  ;;  %p404_p11 = scmp.lt.s32.totalorder %s259_s10, %s259_s10 }
  0x39   :  { %297 = vmatprep.mubr.msk.f32.mxu0 %vm79_vm0, %v62_v5  ;;  %312 = vmatprep.subr.bf16.mxu0 %v311_v3  ;;  %v319_v9 = vpack.c.bf16 %v69_v8, %v68_v7  ;;  %v70_v11 = vld [vmem:[#allocation7 + $0x10] sm:$0xff]  ;;  %v71_v12 = vld [vmem:[#allocation7 + $0x18] sm:$0xff] }
  0x3a   :  { %314 = vmatpush3.bf16.msra.mxu0 %v311_v3  ;;  %v323_v13 = vpack.c.bf16 %v71_v12, %v70_v11  ;;  %v271_v14 = vld [vmem:[%s544_s2] ss:$0 sm:$0xff]  ;;  %s399_s2 = scalar_lea.vmem %s259_s10, 256 }
  0x3b   :  { %316 = vmatprep.subr.bf16.mxu0 %v315_v6  ;;  %320 = vmatprep.subr.bf16.mxu1 %v319_v9  ;;  %v274_v21 = vld [vmem:[%s546_s4] ss:$0 sm:$0xff]  ;;  %p400_p10 = scmp.ne.s32.totalorder %s259_s10, %s399_s2  ;;  %p405_p12 = scmp.lt.s32.totalorder %s399_s2, %s399_s2 }
  0x3c   :  { %322 = vmatpush3.bf16.msra.mxu1 %v319_v9 }
  0x3d   :  { %324 = vmatprep.subr.bf16.mxu1 %v323_v13  ;;  %p406_p13 = por %p405_p12, %p404_p11 }
  0x3e   :  { %318 = vmatpush3.bf16.msra.mxu0 %v315_v6 }
  0x3f   :  { %p407_p0 = pnand %p406_p13, %p400_p10 }
  0x40   :  { %326 = vmatpush3.bf16.msra.mxu1 %v323_v13 }
  0x41   :  { %298 = vmatmul.mubr.msk.f32.vlgmr.msra.gmra.mrb[0].mxu0 %vm79_vm0, %v63_v10 }
 0x114   :  { %v299_v15 = vpop.f32.mrb[0].mxu0 }
 0x115   :  { %v158_v16 = vadd.f32 %v299_v15, %v271_v14  ;;  %v152_v17 = vpop.f32.mrb[1].mxu0 }
 0x116   :  { %v153_v18 = vadd.f32 %v271_v14, %v152_v17 }
 0x117   :  { %v162_v20 = vmax.f32 %v158_v16, 0.0 }
 0x118   :  { %v161_v19 = vmax.f32 %v153_v18, 0.0 }
 0x11a   :  { %308 = vmatprep.mubr.msk.f32.mxu1 %vm79_vm0, %v161_v19 }
 0x11b   :  { %309 = vmatmul.mubr.msk.f32.vlgmr.msra.gmra.mrb[0].mxu1 %vm79_vm0, %v162_v20 }
 0x1ee   :  { %v310_v22 = vpop.f32.mrb[0].mxu1 }
 0x1ef   :  { %v248_v23 = vadd.f32 %v310_v22, %v274_v21  ;;  %v242_v24 = vpop.f32.mrb[1].mxu1 }
 0x1f0   :  { %v243_v25 = vadd.f32 %v274_v21, %v242_v24 }
 0x1f1   :  { %252 = vst.msk [vmem:[#allocation8 + $0x8] sm:$0xff] %vm79_vm0, %v248_v23 }
 0x1f2   :  { %251 = vst.msk [vmem:[#allocation8] sm:$0xff] %vm79_vm0, %v243_v25 }
 0x1f3   :  { %410 = shalt.err (!%p407_p0)
}
 0x1f4   :  { %s411_s12 = scalar_lea.hbm %s547_s5, 256 }
 0x1f5   :  { %p412_p1 = scmp.ne.s32.totalorder %s547_s5, %s411_s12  ;;  %p415_p2 = scmp.lt.u32.totalorder %s411_s12, %s547_s5 }
 0x1f7   :  { %p417_p3 = pnand %p415_p2, %p412_p1 }
 0x1f9   :  { %420 = shalt.err (!%p417_p3)
}
 0x1fa   :  { %264 = dma.vmem_to_hbm [thread:$0]  %s259_s10, 256, %s547_s5, [#allocation4], %s429_s30, %s429_s30, %s430_s6  }
 0x1fb   :  { %425 = dma.done.wait [#allocation4], 256  }
 0x1fc   :  { %426 = vsyncadd [#allocation4], 4294967040 }
 0x1fd   :  { %268 = vsyncpa [#allocation3], 1 }
 0x1fe   :  { %269 = vsyncpa [#allocation6], 1 }
 0x1ff   :  { %270 = vsyncpa [#allocation4], 1 }

</bundles_post_ra>
